<compile_context>
chip_gen: v7x
topology: tpu7x:2x2x1
jax: 0.10.0
libtpu: 0.0.40
codegen_flags: <defaults>
</compile_context>

<pallas_src>
import functools

import jax
import jax.numpy as jnp
from jax.experimental import pallas as pl
from jax.experimental.pallas import tpu as pltpu

LANES = 128
HID1, HID2 = 128, 64   # hidden sizes from the PyTorch module


def _round_up(n, m):
    return (n + m - 1) // m * m


def d3qn_kernel(x_ref, w_ref, b_ref, q_ref, xpad_ref, *, input_dim, num_actions):
    """
    x_ref    : (TB, input_dim) f32    -- raw states, narrow HBM read
    w_ref    : (512, 128)      bf16   -- [w1; w2; wh1; wh2_folded] stacked on sublanes
    b_ref    : (4, 128)        f32    -- [b1; b2; bh1; bh2_folded]
    q_ref    : (TB, num_actions) f32  -- Q values, narrow HBM write
    xpad_ref : (TB, 128)       f32    -- VMEM scratch: zero-padded state tile
    """
    # Zero-pad the state to a full 128-lane tile in VMEM (cheap: ~TB/8 vreg stores)
    # instead of paying 16x-inflated HBM reads for a host-padded input.
    xpad_ref[...] = jnp.zeros_like(xpad_ref)
    xpad_ref[:, :input_dim] = x_ref[...]
    x = xpad_ref[...].astype(jnp.bfloat16)                              # (TB,128) bf16

    w1 = w_ref[0:128, :]
    w2 = w_ref[128:256, :]
    wh1 = w_ref[256:384, :]
    wh2 = w_ref[384:512, :]

    # Block: Linear(input_dim,128)+ReLU -> Linear(128,64 padded to 128)+ReLU
    h1 = jnp.dot(x, w1, preferred_element_type=jnp.float32) + b_ref[0:1, :]
    h1 = jnp.maximum(h1, 0.0)
    h2 = jnp.dot(h1.astype(jnp.bfloat16), w2,
                 preferred_element_type=jnp.float32) + b_ref[1:2, :]
    h2 = jnp.maximum(h2, 0.0)                                            # cols 64.. are 0

    # Fused dueling heads, layer 1: cols [0,64) advantage hidden, [64,128) value hidden.
    hh = jnp.dot(h2.astype(jnp.bfloat16), wh1,
                 preferred_element_type=jnp.float32) + b_ref[2:3, :]
    hh = jnp.maximum(hh, 0.0)

    # Head layer 2 with the dueling combine Q = V + (A - mean(A)) folded into the packed
    # weights at pack time -> no cross-lane reductions / selects in the epilogue.
    q = jnp.dot(hh.astype(jnp.bfloat16), wh2,
                preferred_element_type=jnp.float32) + b_ref[3:4, :]

    # Narrow, lane-masked store of only the useful Q columns.
    q_ref[...] = q[:, :num_actions]


def pack_params(p, input_dim, num_actions):
    """Pack PyTorch-layout params into two kernel operand slabs (weights bf16, biases f32)."""
    assert input_dim <= LANES
    assert num_actions + 1 <= LANES, "V column would collide with lane padding"
    f32 = jnp.float32
    na = num_actions

    # Layer 1: Linear(input_dim, 128). weight (128,in) -> (in,128); K padded to 128 (zero rows).
    w1 = jnp.zeros((LANES, LANES), f32).at[:input_dim, :].set(p["w1"].T)
    b1 = jnp.asarray(p["b1"], f32)

    # Layer 2: Linear(128, 64). N padded to 128 (zero cols) so h2 stays 128-wide.
    w2 = jnp.zeros((LANES, LANES), f32).at[:, :HID2].set(p["w2"].T)
    b2 = jnp.zeros((LANES,), f32).at[:HID2].set(p["b2"])

    # Fused head layer 1: [wa1.T | wv1.T] stacked column-wise (rows 64.. zero).
    wh1 = jnp.zeros((LANES, LANES), f32)
    wh1 = wh1.at[:HID2, :HID2].set(p["wa1"].T).at[:HID2, HID2:2 * HID2].set(p["wv1"].T)
    bh1 = jnp.zeros((LANES,), f32).at[:HID2].set(p["ba1"]).at[HID2:2 * HID2].set(p["bv1"])

    # Fused head layer 2: block-diagonal -> cols [0,na) = A, col na = V, rest zero.
    wh2 = jnp.zeros((LANES, LANES), f32)
    wh2 = wh2.at[:HID2, :na].set(p["wa2"].T)
    wh2 = wh2.at[HID2:2 * HID2, na].set(p["wv2"][0, :])
    bh2 = jnp.zeros((LANES,), f32).at[:na].set(p["ba2"]).at[na].set(p["bv2"][0])

    # Fold the dueling combine: Q = AV @ T with T[:na,:na] = I - 1/na, T[na,:na] = 1,
    # other columns zero. Done in f32, then the whole slab is cast to bf16.
    T = jnp.zeros((LANES, LANES), f32)
    T = T.at[:na, :na].set(jnp.eye(na, dtype=f32) - 1.0 / na)
    T = T.at[na, :na].set(1.0)
    wh2 = wh2 @ T
    bh2 = bh2 @ T

    w_slab = jnp.concatenate([w1, w2, wh1, wh2], axis=0).astype(jnp.bfloat16)  # (512,128)
    b_slab = jnp.stack([b1, b2, bh1, bh2], axis=0)                             # (4,128) f32
    return w_slab, b_slab


def d3qn_forward(x, w_slab, b_slab, num_actions):
    """x: (B, input_dim) float32. Returns Q: (B, num_actions) float32 (is_sample==1 path)."""
    B, input_dim = x.shape
    x = x.astype(jnp.float32)

    # Batch tiling: tiny (action-selection) batches get a single 16-row tile; bigger
    # batches get >=2 tiles (so the parallel axis feeds both v7x TensorCores), with the
    # tile capped at 1024 rows to amortize per-grid-step overhead (VMEM stays tiny).
    if B <= 16:
        TB = 16
    else:
        half = (B + 1) // 2
        TB = min(1024, _round_up(half, 16))
    B_pad = _round_up(B, TB)
    if B_pad != B:
        x = jnp.pad(x, ((0, B_pad - B), (0, 0)))

    kernel = functools.partial(d3qn_kernel, input_dim=input_dim, num_actions=num_actions)

    q = pl.pallas_call(
        kernel,
        out_shape=jax.ShapeDtypeStruct((B_pad, num_actions), jnp.float32),
        grid=(B_pad // TB,),
        in_specs=[
            pl.BlockSpec((TB, input_dim), lambda i: (i, 0)),       # narrow state read
            pl.BlockSpec((4 * LANES, LANES), lambda i: (0, 0)),    # weight slab (grid-invariant)
            pl.BlockSpec((4, LANES), lambda i: (0, 0)),            # bias slab
        ],
        out_specs=pl.BlockSpec((TB, num_actions), lambda i: (i, 0)),
        scratch_shapes=[pltpu.VMEM((TB, LANES), jnp.float32)],
        compiler_params=pltpu.CompilerParams(dimension_semantics=("parallel",)),
    )(x, w_slab, b_slab)

    return q[:B]


# ------------------------------------------------------------------ init / reference

def init_params(key, input_dim, num_actions):
    """PyTorch-layout params (weight (out,in), bias (out,)) with nn.Linear-style init."""
    ks = jax.random.split(key, 12)

    def kaiming(k, out_f, in_f):  # kaiming_uniform_, nonlinearity='relu'
        bound = (6.0 / in_f) ** 0.5
        return jax.random.uniform(k, (out_f, in_f), minval=-bound, maxval=bound,
                                  dtype=jnp.float32)

    def bias(k, out_f, in_f):     # default nn.Linear bias init
        bound = 1.0 / (in_f ** 0.5)
        return jax.random.uniform(k, (out_f,), minval=-bound, maxval=bound,
                                  dtype=jnp.float32)

    return {
        "w1": kaiming(ks[0], 128, input_dim), "b1": bias(ks[1], 128, input_dim),
        "w2": kaiming(ks[2], 64, 128),        "b2": bias(ks[3], 64, 128),
        "wa1": kaiming(ks[4], 64, 64),        "ba1": bias(ks[5], 64, 64),
        "wa2": kaiming(ks[6], num_actions, 64), "ba2": bias(ks[7], num_actions, 64),
        "wv1": kaiming(ks[8], 64, 64),        "bv1": bias(ks[9], 64, 64),
        "wv2": kaiming(ks[10], 1, 64),        "bv2": bias(ks[11], 1, 64),
    }


def reference_forward(x, p):
    """Pure-JAX reference (is_sample == 1 path), structured like the PyTorch module
    (separate A/V heads, combine after) with bf16-rounded operands / f32 accumulation."""
    r = lambda a: a.astype(jnp.bfloat16).astype(jnp.float32)
    hp = jax.lax.Precision.HIGHEST

    def lin(h, w, b):
        return jnp.dot(r(h), r(w).T, precision=hp) + b

    h = jnp.maximum(lin(x, p["w1"], p["b1"]), 0.0)
    h = jnp.maximum(lin(h, p["w2"], p["b2"]), 0.0)
    a1 = jnp.maximum(lin(h, p["wa1"], p["ba1"]), 0.0)
    A = lin(a1, p["wa2"], p["ba2"])
    v1 = jnp.maximum(lin(h, p["wv1"], p["bv1"]), 0.0)
    V = lin(v1, p["wv2"], p["bv2"])
    return V + (A - A.mean(axis=1, keepdims=True))


if __name__ == "__main__":
    # LunarLander: observation dim 8, 4 actions.
    input_dim, num_actions = 8, 4

    key = jax.random.PRNGKey(0)
    k_params, k_x_small, k_x_big = jax.random.split(key, 3)
    params = init_params(k_params, input_dim, num_actions)
    w_slab, b_slab = pack_params(params, input_dim, num_actions)

    # Tolerance note: the kernel's folded head-2 weights are rounded to bf16 after the
    # dueling-combine fold, while the reference rounds wa2/wv2 separately and combines
    # in f32 -> small, bounded differences; 1e-2 covers them with margin.
    TOL = dict(atol=1e-2, rtol=1e-2)

    # Small (action-selection style) batch -> single 16-row tile.
    x_small = jax.random.normal(k_x_small, (2, input_dim), dtype=jnp.float32)
    q_small = jax.block_until_ready(d3qn_forward(x_small, w_slab, b_slab, num_actions))
    assert q_small.shape == (2, num_actions)
    assert jnp.allclose(q_small, reference_forward(x_small, params), **TOL), \
        "small-batch mismatch vs reference"

    # Replay-buffer style batch exercising batch padding + the 2-tile parallel grid.
    x_big = jax.random.normal(k_x_big, (500, input_dim), dtype=jnp.float32)
    q_big = jax.block_until_ready(d3qn_forward(x_big, w_slab, b_slab, num_actions))
    assert q_big.shape == (500, num_actions)
    assert jnp.allclose(q_big, reference_forward(x_big, params), **TOL), \
        "large-batch mismatch vs reference"

    # TODO(synk): is_sample==0 path (host-side .item() of mean advantage) and the (V, A)
    # tuple return are host-side glue, not kernelized.
    print("KERNEL_OK")
</pallas_src>

<mosaic_0001>
module attributes {stable_mosaic.version = 11 : i64} {
  func.func @d3qn_kernel(%arg0: i32, %arg1: memref<16x8xf32, #tpu.memory_space<vmem>>, %arg2: memref<512x128xbf16, #tpu.memory_space<vmem>>, %arg3: memref<4x128xf32, #tpu.memory_space<vmem>>, %arg4: memref<16x4xf32, #tpu.memory_space<vmem>>, %arg5: memref<16x128xf32, #tpu.memory_space<vmem>>) attributes {dimension_semantics = [#tpu.dimension_semantics<parallel>], iteration_bounds = array<i64: 1>, scalar_prefetch = 0 : i64, scratch_operands = 1 : i64, tpu.core_type = #tpu.core_type<tc>, window_params = [{transform_indices = @transform_0, window_bounds = array<i64: 16, 8>}, {pipeline_mode = #tpu.pipeline_mode<synchronous>, transform_indices = @transform_1, window_bounds = array<i64: 512, 128>}, {pipeline_mode = #tpu.pipeline_mode<synchronous>, transform_indices = @transform_2, window_bounds = array<i64: 4, 128>}, {transform_indices = @transform_3, window_bounds = array<i64: 16, 4>}]} {
    %cst = arith.constant 0.000000e+00 : f32
    %0 = vector.broadcast %cst : f32 to vector<16x128xf32>
    %c0 = arith.constant 0 : index
    %c0_0 = arith.constant 0 : index
    %1 = vector.load %arg5[%c0, %c0_0] : memref<16x128xf32, #tpu.memory_space<vmem>>, vector<16x128xf32>
    tpu.vector_store %arg5[%c0, %c0_0], %0 {strides = array<i32>} : memref<16x128xf32, #tpu.memory_space<vmem>>, vector<16x128xf32>,
    %c0_1 = arith.constant 0 : index
    %c0_2 = arith.constant 0 : index
    %2 = vector.load %arg1[%c0_1, %c0_2] : memref<16x8xf32, #tpu.memory_space<vmem>>, vector<16x8xf32>
    %c0_3 = arith.constant 0 : index
    %c0_4 = arith.constant 0 : index
    %3 = vector.load %arg5[%c0_3, %c0_4] : memref<16x128xf32, #tpu.memory_space<vmem>>, vector<16x8xf32>
    tpu.vector_store %arg5[%c0_3, %c0_4], %2 {strides = array<i32>} : memref<16x128xf32, #tpu.memory_space<vmem>>, vector<16x8xf32>,
    %c0_5 = arith.constant 0 : index
    %c0_6 = arith.constant 0 : index
    %4 = vector.load %arg5[%c0_5, %c0_6] : memref<16x128xf32, #tpu.memory_space<vmem>>, vector<16x128xf32>
    %5 = arith.truncf %4 : vector<16x128xf32> to vector<16x128xbf16>
    %c0_7 = arith.constant 0 : index
    %c0_8 = arith.constant 0 : index
    %6 = vector.load %arg2[%c0_7, %c0_8] : memref<512x128xbf16, #tpu.memory_space<vmem>>, vector<128x128xbf16>
    %c128 = arith.constant 128 : index
    %c0_9 = arith.constant 0 : index
    %7 = vector.load %arg2[%c128, %c0_9] : memref<512x128xbf16, #tpu.memory_space<vmem>>, vector<128x128xbf16>
    %c256 = arith.constant 256 : index
    %c0_10 = arith.constant 0 : index
    %8 = vector.load %arg2[%c256, %c0_10] : memref<512x128xbf16, #tpu.memory_space<vmem>>, vector<128x128xbf16>
    %c384 = arith.constant 384 : index
    %c0_11 = arith.constant 0 : index
    %9 = vector.load %arg2[%c384, %c0_11] : memref<512x128xbf16, #tpu.memory_space<vmem>>, vector<128x128xbf16>
    %cst_12 = arith.constant dense<0.000000e+00> : vector<16x128xf32>
    %10 = tpu.matmul %5, %6, %cst_12 {dimension_numbers = #tpu.dot_dimension_numbers<[1], [0], [0], [1], [0, 0, 1, 1], [], []>} : vector<16x128xbf16>, vector<128x128xbf16>, vector<16x128xf32> -> vector<16x128xf32>
    %c0_13 = arith.constant 0 : index
    %c0_14 = arith.constant 0 : index
    %11 = vector.load %arg3[%c0_13, %c0_14] : memref<4x128xf32, #tpu.memory_space<vmem>>, vector<1x128xf32>
    %12 = vector.broadcast %11 : vector<1x128xf32> to vector<16x128xf32>
    %13 = arith.addf %10, %12 : vector<16x128xf32>
    %cst_15 = arith.constant 0.000000e+00 : f32
    %14 = vector.broadcast %cst_15 : f32 to vector<16x128xf32>
    %15 = arith.maximumf %13, %14 : vector<16x128xf32>
    %16 = arith.truncf %15 : vector<16x128xf32> to vector<16x128xbf16>
    %cst_16 = arith.constant dense<0.000000e+00> : vector<16x128xf32>
    %17 = tpu.matmul %16, %7, %cst_16 {dimension_numbers = #tpu.dot_dimension_numbers<[1], [0], [0], [1], [0, 0, 1, 1], [], []>} : vector<16x128xbf16>, vector<128x128xbf16>, vector<16x128xf32> -> vector<16x128xf32>
    %c1 = arith.constant 1 : index
    %c0_17 = arith.constant 0 : index
    %18 = vector.load %arg3[%c1, %c0_17] : memref<4x128xf32, #tpu.memory_space<vmem>>, vector<1x128xf32>
    %19 = vector.broadcast %18 : vector<1x128xf32> to vector<16x128xf32>
    %20 = arith.addf %17, %19 : vector<16x128xf32>
    %cst_18 = arith.constant 0.000000e+00 : f32
    %21 = vector.broadcast %cst_18 : f32 to vector<16x128xf32>
    %22 = arith.maximumf %20, %21 : vector<16x128xf32>
    %23 = arith.truncf %22 : vector<16x128xf32> to vector<16x128xbf16>
    %cst_19 = arith.constant dense<0.000000e+00> : vector<16x128xf32>
    %24 = tpu.matmul %23, %8, %cst_19 {dimension_numbers = #tpu.dot_dimension_numbers<[1], [0], [0], [1], [0, 0, 1, 1], [], []>} : vector<16x128xbf16>, vector<128x128xbf16>, vector<16x128xf32> -> vector<16x128xf32>
    %c2 = arith.constant 2 : index
    %c0_20 = arith.constant 0 : index
    %25 = vector.load %arg3[%c2, %c0_20] : memref<4x128xf32, #tpu.memory_space<vmem>>, vector<1x128xf32>
    %26 = vector.broadcast %25 : vector<1x128xf32> to vector<16x128xf32>
    %27 = arith.addf %24, %26 : vector<16x128xf32>
    %cst_21 = arith.constant 0.000000e+00 : f32
    %28 = vector.broadcast %cst_21 : f32 to vector<16x128xf32>
    %29 = arith.maximumf %27, %28 : vector<16x128xf32>
    %30 = arith.truncf %29 : vector<16x128xf32> to vector<16x128xbf16>
    %cst_22 = arith.constant dense<0.000000e+00> : vector<16x128xf32>
    %31 = tpu.matmul %30, %9, %cst_22 {dimension_numbers = #tpu.dot_dimension_numbers<[1], [0], [0], [1], [0, 0, 1, 1], [], []>} : vector<16x128xbf16>, vector<128x128xbf16>, vector<16x128xf32> -> vector<16x128xf32>
    %c3 = arith.constant 3 : index
    %c0_23 = arith.constant 0 : index
    %32 = vector.load %arg3[%c3, %c0_23] : memref<4x128xf32, #tpu.memory_space<vmem>>, vector<1x128xf32>
    %33 = vector.broadcast %32 : vector<1x128xf32> to vector<16x128xf32>
    %34 = arith.addf %31, %33 : vector<16x128xf32>
    %35 = vector.extract_strided_slice %34 {offsets = [0, 0], sizes = [16, 4], strides = [1, 1]} : vector<16x128xf32> to vector<16x4xf32>
    %c0_24 = arith.constant 0 : index
    %c0_25 = arith.constant 0 : index
    %36 = vector.load %arg4[%c0_24, %c0_25] : memref<16x4xf32, #tpu.memory_space<vmem>>, vector<16x4xf32>
    tpu.vector_store %arg4[%c0_24, %c0_25], %35 {strides = array<i32>} : memref<16x4xf32, #tpu.memory_space<vmem>>, vector<16x4xf32>,
    return
  }
  func.func @transform_0(%arg0: i32) -> (i32, i32) {
    %c0_i32 = arith.constant 0 : i32
    %c0_i32_0 = arith.constant 0 : i32
    return %arg0, %c0_i32 : i32, i32
  }
  func.func @transform_1(%arg0: i32) -> (i32, i32) {
    %c0_i32 = arith.constant 0 : i32
    %c0_i32_0 = arith.constant 0 : i32
    %c0_i32_1 = arith.constant 0 : i32
    return %c0_i32, %c0_i32_0 : i32, i32
  }
  func.func @transform_2(%arg0: i32) -> (i32, i32) {
    %c0_i32 = arith.constant 0 : i32
    %c0_i32_0 = arith.constant 0 : i32
    %c0_i32_1 = arith.constant 0 : i32
    return %c0_i32, %c0_i32_0 : i32, i32
  }
  func.func @transform_3(%arg0: i32) -> (i32, i32) {
    %c0_i32 = arith.constant 0 : i32
    %c0_i32_0 = arith.constant 0 : i32
    return %arg0, %c0_i32 : i32, i32
  }
}

</mosaic_0001>

<bundles_post_ra>
// kernel: tpu_custom_call.1
= control target key start
LH: loop header
LB: loop body
LE: loop exit
PB: predicated region body
PF: predicated region fallthrough
CT: control target
= control target key end

     0   :  { %8 = vsyncpa [#allocation4], 0  ;;  %s709_s12 = smov [#allocation3]   ;;  %s812_s0 = inlined_call_operand.vmem [shape: f32[16,8], index: 0, kind: input, shape index: {}]   ;;  %s813_s1 = inlined_call_operand.hbm [shape: bf16[512,128], index: 1, kind: input, shape index: {}]   ;;  %s814_s2 = inlined_call_operand.vmem [shape: f32[4,128], index: 2, kind: input, shape index: {}]   ;;  %s815_s3 = inlined_call_operand.vmem [shape: f32[16,4], index: 3, kind: output, shape index: {}]  }
   0x1   :  { %s16_s13 = sshll.u32 %s709_s12, 4  ;;  %s685_s16 = scalar_lea.hbm %s813_s1, 4096  ;;  %s17_s13 = int_to_ptr.vmem [resolvable:$true] %s16_s13 }
   0x2   :  { %p686_p0 = scmp.ne.s32.totalorder %s813_s1, %s685_s16  ;;  %p689_p1 = scmp.lt.u32.totalorder %s685_s16, %s813_s1 }
   0x4   :  { %p691_p2 = pnand %p689_p1, %p686_p0 }
   0x6   :  { %694 = shalt.err (!%p691_p2)
}
   0x7   :  { %s695_s21 = scalar_lea.vmem %s17_s13, 4096  ;;  %p700_p4 = scmp.lt.s32.totalorder %s17_s13, %s17_s13 }
   0x8   :  { %p696_p3 = scmp.ne.s32.totalorder %s17_s13, %s695_s21  ;;  %p701_p5 = scmp.lt.s32.totalorder %s695_s21, %s695_s21 }
   0xa   :  { %p702_p6 = por %p701_p5, %p700_p4 }
   0xc   :  { %p703_p7 = pnand %p702_p6, %p696_p3 }
   0xe   :  { %706 = shalt.err (!%p703_p7)
}
   0xf   :  { %s710_s22 = smov 64   ;;  %s711_s23 = smov 4  }
  0x10   :  { %22 = dma.hbm_to_vmem [thread:$0]  %s813_s1, 4096, %s17_s13, [#allocation4], %s710_s22, %s710_s22, %s711_s23  }
  0x11   :  { %707 = dma.done.wait [#allocation4], 4096  }
  0x12   :  { %708 = vsyncadd [#allocation4], 4294963200  ;;  %v712_v0 = vmov 0.0   ;;  %vm713_vm0 = vmmov 0   ;;  %v653_v1 = vld [vmem:[#allocation3] sm:$0xff]   ;;  %v654_v2 = vld [vmem:[#allocation3 + $0x8] sm:$0xff]  }
  0x13   :  { %568 = vmatprep.subr.bf16.mxu0 %v712_v0  ;;  %29 = vst [vmem:[#allocation2] sm:$0xff] %v712_v0  ;;  %30 = vst [vmem:[#allocation2 + $0x8] sm:$0xff] %v712_v0  ;;  %584 = vmatprep.mubr.msk.bf16.mxu0 %vm713_vm0, %v712_v0  ;;  %v655_v3 = vld [vmem:[#allocation3 + $0x10] sm:$0xff]   ;;  %vm33_vm1 = vcmask 64512   ;;  %v32_v5 = vld [vmem:[%s812_s0 + $0x8] sm:$0xff]  ;;  %vm488_vm2 = vcmask 31744  }
  0x14   :  { %588 = vmatprep.subr.bf16.mxu1 %v712_v0  ;;  %604 = vmatprep.mubr.msk.bf16.mxu1 %vm713_vm0, %v712_v0  ;;  %v31_v4 = vld [vmem:[%s812_s0] sm:$0xff]  ;;  %35 = vst.msk [vmem:[#allocation2 + $0x8] sm:$0xff] %vm33_vm1, %v32_v5  ;;  %v661_v6 = vld [vmem:[#allocation3 + $0x40] sm:$0xff]   ;;  %v656_v7 = vld [vmem:[#allocation3 + $0x18] sm:$0xff]  }
  0x15   :  { %569 = vmatpush3.bf16.msra.mxu0 %v653_v1  ;;  %34 = vst.msk [vmem:[#allocation2] sm:$0xff] %vm33_vm1, %v31_v4  ;;  %589 = vmatpush3.bf16.msra.mxu1 %v661_v6  ;;  %v662_v8 = vld [vmem:[#allocation3 + $0x48] sm:$0xff]   ;;  %v657_v9 = vld [vmem:[#allocation3 + $0x20] sm:$0xff]   ;;  %v663_v10 = vld [vmem:[#allocation3 + $0x50] sm:$0xff]  }
  0x16   :  { %570 = vmatprep.subr.bf16.mxu0 %v712_v0  ;;  %590 = vmatprep.subr.bf16.mxu1 %v712_v0  ;;  %v658_v11 = vld [vmem:[#allocation3 + $0x28] sm:$0xff]   ;;  %v664_v12 = vld [vmem:[#allocation3 + $0x58] sm:$0xff]   ;;  %v659_v13 = vld [vmem:[#allocation3 + $0x30] sm:$0xff]  }
  0x17   :  { %v665_v14 = vld [vmem:[#allocation3 + $0x60] sm:$0xff]   ;;  %v660_v15 = vld [vmem:[#allocation3 + $0x38] sm:$0xff]   ;;  %v666_v18 = vld [vmem:[#allocation3 + $0x68] sm:$0xff]  }
  0x18   :  { %v667_v20 = vld [vmem:[#allocation3 + $0x70] sm:$0xff]   ;;  %v668_v21 = vld [vmem:[#allocation3 + $0x78] sm:$0xff]   ;;  %v669_v22 = vld [vmem:[#allocation3 + $0x80] sm:$0xff]  }
  0x19   :  { %571 = vmatpush3.bf16.msra.mxu0 %v654_v2  ;;  %591 = vmatpush3.bf16.msra.mxu1 %v662_v8  ;;  %v670_v23 = vld [vmem:[#allocation3 + $0x88] sm:$0xff]   ;;  %v671_v24 = vld [vmem:[#allocation3 + $0x90] sm:$0xff]   ;;  %v672_v25 = vld [vmem:[#allocation3 + $0x98] sm:$0xff]  }
  0x1a   :  { %572 = vmatprep.subr.bf16.mxu0 %v712_v0  ;;  %592 = vmatprep.subr.bf16.mxu1 %v712_v0  ;;  %v673_v26 = vld [vmem:[#allocation3 + $0xa0] sm:$0xff]   ;;  %v674_v27 = vld [vmem:[#allocation3 + $0xa8] sm:$0xff]   ;;  %v496_v28 = vld [vmem:[%s814_s2] ss:$0 sm:$0xff] }
  0x1b   :  { %v37_v17 = vld [vmem:[#allocation2 + $0x8] sm:$0xff]  ;;  %v675_v38 = vld [vmem:[#allocation3 + $0xb0] sm:$0xff]   ;;  %v677_v40 = vld [vmem:[#allocation3 + $0xc0] sm:$0xff]  }
  0x1c   :  { %v36_v16 = vld [vmem:[#allocation2] sm:$0xff]  ;;  %v676_v39 = vld [vmem:[#allocation3 + $0xb8] sm:$0xff]   ;;  %v678_v41 = vld [vmem:[#allocation3 + $0xc8] sm:$0xff]  }
  0x1d   :  { %573 = vmatpush3.bf16.msra.mxu0 %v655_v3  ;;  %593 = vmatpush3.bf16.msra.mxu1 %v663_v10  ;;  %v38_v19 = vpack.c.bf16 %v37_v17, %v36_v16  ;;  %v679_v42 = vld [vmem:[#allocation3 + $0xd0] sm:$0xff]   ;;  %v680_v43 = vld [vmem:[#allocation3 + $0xd8] sm:$0xff]   ;;  %v681_v44 = vld [vmem:[#allocation3 + $0xe0] sm:$0xff]  }
  0x1e   :  { %574 = vmatprep.subr.bf16.mxu0 %v712_v0  ;;  %594 = vmatprep.subr.bf16.mxu1 %v712_v0  ;;  %v682_v45 = vld [vmem:[#allocation3 + $0xe8] sm:$0xff]   ;;  %v505_v46 = vld [vmem:[%s814_s2 + $0x1] ss:$0 sm:$0xff]  ;;  %v684_v57 = vld [vmem:[#allocation3 + $0xf8] sm:$0xff]  }
  0x1f   :  { %v683_v56 = vld [vmem:[#allocation3 + $0xf0] sm:$0xff]  }
  0x20   :  { %v514_v58 = vld [vmem:[%s814_s2 + $0x2] ss:$0 sm:$0xff] }
  0x21   :  { %575 = vmatpush3.bf16.msra.mxu0 %v656_v7  ;;  %595 = vmatpush3.bf16.msra.mxu1 %v664_v12 }
  0x22   :  { %576 = vmatprep.subr.bf16.mxu0 %v712_v0  ;;  %596 = vmatprep.subr.bf16.mxu1 %v712_v0 }
  0x25   :  { %577 = vmatpush3.bf16.msra.mxu0 %v657_v9  ;;  %597 = vmatpush3.bf16.msra.mxu1 %v665_v14 }
  0x26   :  { %578 = vmatprep.subr.bf16.mxu0 %v712_v0  ;;  %598 = vmatprep.subr.bf16.mxu1 %v712_v0 }
  0x29   :  { %579 = vmatpush3.bf16.msra.mxu0 %v658_v11  ;;  %599 = vmatpush3.bf16.msra.mxu1 %v666_v18 }
  0x2a   :  { %580 = vmatprep.subr.bf16.mxu0 %v712_v0  ;;  %600 = vmatprep.subr.bf16.mxu1 %v712_v0 }
  0x2d   :  { %581 = vmatpush3.bf16.msra.mxu0 %v659_v13  ;;  %601 = vmatpush3.bf16.msra.mxu1 %v667_v20 }
  0x2e   :  { %582 = vmatprep.subr.bf16.mxu0 %v712_v0  ;;  %602 = vmatprep.subr.bf16.mxu1 %v712_v0 }
  0x31   :  { %583 = vmatpush3.bf16.msra.mxu0 %v660_v15  ;;  %603 = vmatpush3.bf16.msra.mxu1 %v668_v21 }
  0x32   :  { %608 = vmatprep.subr.bf16.mxu0 %v712_v0  ;;  %628 = vmatprep.subr.bf16.mxu1 %v712_v0 }
  0x34   :  { %585 = vmatmul.mubr.bf16.vlgmr.msra.gmra.mrb[0].mxu0 %v38_v19 }
  0x35   :  { %624 = vmatprep.mubr.msk.bf16.mxu0 %vm713_vm0, %v712_v0  ;;  %609 = vmatpush3.bf16.msra.mxu0 %v669_v22 }
  0x36   :  { %610 = vmatprep.subr.bf16.mxu0 %v712_v0 }
  0x39   :  { %611 = vmatpush3.bf16.msra.mxu0 %v670_v23 }
  0x3a   :  { %612 = vmatprep.subr.bf16.mxu0 %v712_v0 }
  0x3d   :  { %613 = vmatpush3.bf16.msra.mxu0 %v671_v24 }
  0x3e   :  { %614 = vmatprep.subr.bf16.mxu0 %v712_v0 }
  0x41   :  { %615 = vmatpush3.bf16.msra.mxu0 %v672_v25 }
  0x42   :  { %616 = vmatprep.subr.bf16.mxu0 %v712_v0 }
  0x45   :  { %617 = vmatpush3.bf16.msra.mxu0 %v673_v26 }
  0x46   :  { %618 = vmatprep.subr.bf16.mxu0 %v712_v0 }
  0x49   :  { %619 = vmatpush3.bf16.msra.mxu0 %v674_v27 }
  0x4a   :  { %620 = vmatprep.subr.bf16.mxu0 %v712_v0 }
  0x4d   :  { %621 = vmatpush3.bf16.msra.mxu0 %v675_v38 }
  0x4e   :  { %622 = vmatprep.subr.bf16.mxu0 %v712_v0 }
  0x51   :  { %623 = vmatpush3.bf16.msra.mxu0 %v676_v39 }
 0x107   :  { %v190_v29 = vpop.f32.mrb[0].mxu0 }
 0x108   :  { %v191_v30 = vadd.f32 %v496_v28, %v190_v29  ;;  %v586_v31 = vpop.f32.mrb[1].mxu0 }
 0x109   :  { %v193_v32 = vpop.f32.mrb[2].mxu0 }
 0x10a   :  { %v194_v33 = vadd.f32 %v496_v28, %v193_v32  ;;  %v587_v34 = vpop.f32.mrb[3].mxu0  ;;  %v197_v35 = vmax.f32 %v191_v30, 0.0 }
 0x10c   :  { %v198_v36 = vmax.f32 %v194_v33, 0.0 }
 0x10e   :  { %v199_v37 = vpack.c.bf16 %v198_v36, %v197_v35 }
 0x110   :  { %605 = vmatmul.mubr.bf16.vlgmr.msra.gmra.mrb[0].mxu1 %v199_v37 }
 0x111   :  { %644 = vmatprep.mubr.msk.bf16.mxu1 %vm713_vm0, %v712_v0  ;;  %629 = vmatpush3.bf16.msra.mxu1 %v677_v40 }
 0x112   :  { %630 = vmatprep.subr.bf16.mxu1 %v712_v0 }
 0x115   :  { %631 = vmatpush3.bf16.msra.mxu1 %v678_v41 }
 0x116   :  { %632 = vmatprep.subr.bf16.mxu1 %v712_v0 }
 0x119   :  { %633 = vmatpush3.bf16.msra.mxu1 %v679_v42 }
 0x11a   :  { %634 = vmatprep.subr.bf16.mxu1 %v712_v0 }
 0x11d   :  { %635 = vmatpush3.bf16.msra.mxu1 %v680_v43 }
 0x11e   :  { %636 = vmatprep.subr.bf16.mxu1 %v712_v0 }
 0x121   :  { %637 = vmatpush3.bf16.msra.mxu1 %v681_v44 }
 0x122   :  { %638 = vmatprep.subr.bf16.mxu1 %v712_v0 }
 0x125   :  { %639 = vmatpush3.bf16.msra.mxu1 %v682_v45 }
 0x126   :  { %640 = vmatprep.subr.bf16.mxu1 %v712_v0 }
 0x129   :  { %641 = vmatpush3.bf16.msra.mxu1 %v683_v56 }
 0x12a   :  { %642 = vmatprep.subr.bf16.mxu1 %v712_v0  ;;  %v523_v0 = vld [vmem:[%s814_s2 + $0x3] ss:$0 sm:$0xff] }
 0x12d   :  { %643 = vmatpush3.bf16.msra.mxu1 %v684_v57 }
 0x1e3   :  { %v287_v47 = vpop.f32.mrb[0].mxu1 }
 0x1e4   :  { %v288_v48 = vadd.f32 %v505_v46, %v287_v47  ;;  %v606_v49 = vpop.f32.mrb[1].mxu1 }
 0x1e5   :  { %v290_v50 = vpop.f32.mrb[2].mxu1 }
 0x1e6   :  { %v291_v51 = vadd.f32 %v505_v46, %v290_v50  ;;  %v607_v52 = vpop.f32.mrb[3].mxu1  ;;  %v294_v53 = vmax.f32 %v288_v48, 0.0 }
 0x1e8   :  { %v295_v54 = vmax.f32 %v291_v51, 0.0 }
 0x1ea   :  { %v296_v55 = vpack.c.bf16 %v295_v54, %v294_v53 }
 0x1ec   :  { %625 = vmatmul.mubr.bf16.vlgmr.msra.gmra.mrb[4].mxu0 %v296_v55 }
 0x2bf   :  { %v384_v59 = vpop.f32.mrb[4].mxu0 }
 0x2c0   :  { %v385_v60 = vadd.f32 %v514_v58, %v384_v59  ;;  %v626_v61 = vpop.f32.mrb[5].mxu0 }
 0x2c1   :  { %v387_v62 = vpop.f32.mrb[6].mxu0 }
 0x2c2   :  { %v388_v63 = vadd.f32 %v514_v58, %v387_v62  ;;  %v627_v1 = vpop.f32.mrb[7].mxu0  ;;  %v391_v2 = vmax.f32 %v385_v60, 0.0 }
 0x2c4   :  { %v392_v3 = vmax.f32 %v388_v63, 0.0 }
 0x2c6   :  { %v393_v4 = vpack.c.bf16 %v392_v3, %v391_v2 }
 0x2c8   :  { %645 = vmatmul.mubr.bf16.vlgmr.msra.gmra.mrb[4].mxu1 %v393_v4 }
 0x39b   :  { %v481_v5 = vpop.f32.mrb[4].mxu1 }
 0x39c   :  { %v482_v6 = vadd.f32 %v523_v0, %v481_v5  ;;  %v646_v7 = vpop.f32.mrb[5].mxu1 }
 0x39d   :  { %v484_v8 = vpop.f32.mrb[6].mxu1 }
 0x39e   :  { %489 = vst.msk [vmem:[%s815_s3] sm:$0xff] %vm488_vm2, %v482_v6  ;;  %v485_v9 = vadd.f32 %v523_v0, %v484_v8  ;;  %v647_v10 = vpop.f32.mrb[7].mxu1 }
 0x3a0   :  { %490 = vst.msk [vmem:[%s815_s3 + $0x8] sm:$0xff] %vm488_vm2, %v485_v9 }
 0x3a1   :  { %495 = vsyncpa [#allocation4], 1 }

</bundles_post_ra>
